<compile_context>
chip_gen: v6e
topology: v6e:2x2x1
jax: 0.10.0
libtpu: 0.0.40
codegen_flags: <defaults>
</compile_context>

<pallas_src>
import functools

import jax
import jax.numpy as jnp
from jax import lax
from jax.experimental import pallas as pl
from jax.experimental.pallas import tpu as pltpu


def _round_up(x: int, m: int) -> int:
    return ((x + m - 1) // m) * m


def _pick_tn(n_l_padded: int, target: int) -> int:
    """Largest multiple of 128 that divides n_l_padded (itself a multiple of 128) and is <= target."""
    q = n_l_padded // 128
    d = min(q, max(1, target // 128))
    while q % d:
        d -= 1
    return 128 * d


def _vmem_capacity_bytes() -> int:
    """Physical VMEM per TensorCore (128 MiB on v5e/v6e, 64 MiB on v7x); conservative fallback."""
    try:
        info = pltpu.get_tpu_info()
        for attr in ("vmem_capacity_bytes", "vmem_size_bytes", "vmem_bytes"):
            v = getattr(info, attr, None)
            if v:
                return int(v)
    except Exception:
        pass
    return 64 << 20


def _mp_linear_acc_kernel(x_ref, w_ref, o_ref, acc_ref):
    # x_ref: (tm, tk)  w_ref: (tk, tn)  o_ref: (tm, tn)  acc_ref: (tm, tn) f32 scratch
    k = pl.program_id(3)

    @pl.when(k == 0)
    def _init():
        acc_ref[...] = jnp.zeros_like(acc_ref)

    acc_ref[...] += jnp.dot(x_ref[...], w_ref[...], preferred_element_type=jnp.float32)

    @pl.when(k == pl.num_programs(3) - 1)
    def _store():
        o_ref[...] = acc_ref[...].astype(o_ref.dtype)


def _mp_linear_f32out_kernel(x_ref, w_ref, o_ref):
    # f32 output: accumulate directly into the K-resident output block (no scratch).
    @pl.when(pl.program_id(3) == 0)
    def _init():
        o_ref[...] = jnp.zeros_like(o_ref)

    o_ref[...] += jnp.dot(x_ref[...], w_ref[...], preferred_element_type=jnp.float32)


@functools.partial(jax.jit, static_argnames=("tm", "tn", "tk", "compute_dtype"))
def model_parallel_linear(x, weights_stacked, *, tm=512, tn=1024, tk=512,
                          compute_dtype=jnp.bfloat16):
    """x: (B, K); weights_stacked: (W, K, N_local)  ->  (B, W * N_local).

    Matches torch: cat([x @ weights_stacked[r] for r in range(W)], dim=1).
    compute_dtype controls the MXU input dtype (default bf16; accumulation stays f32).
    Output dtype == input dtype (as in the torch module).
    """
    B, K = x.shape
    W, K2, N_local = weights_stacked.shape
    assert K == K2
    out_dtype = x.dtype  # captured before any compute-dtype cast

    if compute_dtype is None:
        compute_dtype = x.dtype
    if x.dtype != compute_dtype:
        x = x.astype(compute_dtype)
    if weights_stacked.dtype != compute_dtype:
        # In production, store the weights in compute_dtype so this HBM pass never
        # happens on the hot path.
        weights_stacked = weights_stacked.astype(compute_dtype)

    in_item = jnp.dtype(compute_dtype).itemsize
    out_item = jnp.dtype(out_dtype).itemsize

    # ---- tile selection --------------------------------------------------------
    m_mult = max(8, 32 // in_item)          # 8 rows (f32), 16 (bf16), 32 (fp8) per packed sublane tile
    tm = min(tm, _round_up(B, m_mult))
    tk = min(tk, _round_up(K, 128))
    Bp = _round_up(B, tm)
    Kp = _round_up(K, tk)

    Nlp = _round_up(N_local, 128)           # per-rank padded output width
    tn = _pick_tn(Nlp, tn)                  # multiple of 128 dividing Nlp
    # Keep at least 2 parallel tiles so both v7x TensorCores get work.
    if (Bp // tm) * W * (Nlp // tn) < 2 and tn > 128:
        tn = _pick_tn(Nlp, tn // 2)
    nj = Nlp // tn

    # ---- padding (no-op when shapes already aligned) ---------------------------
    if (Bp, Kp) != (B, K):
        x = jnp.pad(x, ((0, Bp - B), (0, Kp - K)))
    if (Kp, Nlp) != (K, N_local):
        weights_stacked = jnp.pad(
            weights_stacked, ((0, 0), (0, Kp - K), (0, Nlp - N_local)))

    grid = (Bp // tm, W, nj, Kp // tk)      # reduction axis (K) last

    direct_f32_out = jnp.dtype(out_dtype) == jnp.dtype(jnp.float32)
    kernel = _mp_linear_f32out_kernel if direct_f32_out else _mp_linear_acc_kernel
    scratch = [] if direct_f32_out else [pltpu.VMEM((tm, tn), jnp.float32)]

    # ---- generation-aware VMEM budget ------------------------------------------
    vmem_need = 2 * (tm * tk + tk * tn) * in_item + 2 * tm * tn * out_item
    if not direct_f32_out:
        vmem_need += tm * tn * 4
    cap = _vmem_capacity_bytes()
    vmem_limit = min(max(int(vmem_need * 1.5) + (4 << 20), 16 << 20), (cap * 3) // 4)

    cost = pl.CostEstimate(
        flops=2 * B * K * W * N_local,
        transcendentals=0,
        bytes_accessed=Bp * Kp * in_item + W * Kp * Nlp * in_item
        + Bp * W * Nlp * out_item,
    )

    out = pl.pallas_call(
        kernel,
        out_shape=jax.ShapeDtypeStruct((Bp, W * Nlp), out_dtype),
        grid_spec=pltpu.PrefetchScalarGridSpec(
            num_scalar_prefetch=0,
            grid=grid,
            in_specs=[
                pl.BlockSpec((tm, tk), lambda i, r, j, k: (i, k)),
                # Index the stacked (W, K, N_local) weights in place — no per-call
                # transpose/reshape in HBM.  Leading dim is squeezed (size 1).
                pl.BlockSpec((None, tk, tn), lambda i, r, j, k: (r, k, j)),
            ],
            # Output block independent of k -> K-resident accumulator tile; column
            # block r*nj + j reproduces torch.cat(dim=1) ordering.
            out_specs=pl.BlockSpec((tm, tn), lambda i, r, j, k: (i, r * nj + j)),
            scratch_shapes=scratch,
        ),
        compiler_params=pltpu.CompilerParams(
            dimension_semantics=("parallel", "parallel", "parallel", "arbitrary"),
            vmem_limit_bytes=vmem_limit,
        ),
        cost_estimate=cost,
    )(x, weights_stacked)

    if (Bp, Nlp) != (B, N_local):
        out = out.reshape(Bp, W, Nlp)[:B, :, :N_local].reshape(B, W * N_local)
    return out


if __name__ == "__main__":
    # Small deterministic problem: batch=8, in_features=32, world_size=2, N_local=128.
    B, K, WORLD, N_LOCAL = 8, 32, 2, 128

    key = jax.random.PRNGKey(0)
    kx, kw = jax.random.split(key)
    x = jax.random.normal(kx, (B, K), dtype=jnp.float32)
    weights_stacked = jax.random.normal(kw, (WORLD, K, N_LOCAL), dtype=jnp.float32)

    # References: full-width matmul against concatenated weights (== all_gather + cat(dim=1)).
    w_full = jnp.concatenate([weights_stacked[r] for r in range(WORLD)], axis=1)
    ref_f32 = jnp.dot(x, w_full, precision=lax.Precision.HIGHEST)
    ref_bf16 = jnp.dot(x.astype(jnp.bfloat16).astype(jnp.float32),
                       w_full.astype(jnp.bfloat16).astype(jnp.float32),
                       precision=lax.Precision.HIGHEST)

    # Default path: bf16 MXU compute, f32 accumulation, f32 output (direct-accumulate kernel).
    out_bf16 = jax.block_until_ready(model_parallel_linear(x, weights_stacked))
    assert out_bf16.shape == (B, WORLD * N_LOCAL)
    assert out_bf16.dtype == x.dtype
    assert jnp.allclose(out_bf16, ref_bf16, atol=1e-2, rtol=1e-2)

    # Explicit f32 compute path.
    out_f32 = jax.block_until_ready(
        model_parallel_linear(x, weights_stacked, compute_dtype=jnp.float32))
    assert jnp.allclose(out_f32, ref_f32, atol=0.2, rtol=2e-2)

    # bf16-in / bf16-out path (exercises the f32 scratch-accumulator kernel variant).
    out_b = jax.block_until_ready(
        model_parallel_linear(x.astype(jnp.bfloat16), weights_stacked))
    assert out_b.dtype == jnp.bfloat16
    assert jnp.allclose(out_b.astype(jnp.float32), ref_bf16, atol=0.25, rtol=5e-2)

    print("KERNEL_OK")
</pallas_src>

<mosaic_0001>
module attributes {stable_mosaic.version = 11 : i64} {
  func.func @_mp_linear_f32out_kernel(%arg0: i32, %arg1: i32, %arg2: i32, %arg3: i32, %arg4: memref<16x128xbf16, #tpu.memory_space<vmem>>, %arg5: memref<1x128x128xbf16, #tpu.memory_space<vmem>>, %arg6: memref<16x128xf32, #tpu.memory_space<vmem>>) attributes {dimension_semantics = [#tpu.dimension_semantics<parallel>, #tpu.dimension_semantics<parallel>, #tpu.dimension_semantics<parallel>, #tpu.dimension_semantics<arbitrary>], iteration_bounds = array<i64: 1, 2, 1, 1>, scalar_prefetch = 0 : i64, scratch_operands = 0 : i64, tpu.core_type = #tpu.core_type<tc>, window_params = [{transform_indices = @transform_0, window_bounds = array<i64: 16, 128>}, {transform_indices = @transform_1, window_bounds = array<i64: 1, 128, 128>}, {transform_indices = @transform_2, window_bounds = array<i64: 16, 128>}]} {
    %c0_i32 = arith.constant 0 : i32
    %0 = arith.cmpi eq, %arg3, %c0_i32 : i32
    %1 = arith.extui %0 : i1 to i32
    %c0_i32_0 = arith.constant 0 : i32
    %2 = arith.cmpi ne, %1, %c0_i32_0 : i32
    scf.if %2 {
      %cst_9 = arith.constant 0.000000e+00 : f32
      %10 = vector.broadcast %cst_9 : f32 to vector<16x128xf32>
      %c0_10 = arith.constant 0 : index
      %c0_11 = arith.constant 0 : index
      %11 = vector.load %arg6[%c0_10, %c0_11] : memref<16x128xf32, #tpu.memory_space<vmem>>, vector<16x128xf32>
      tpu.vector_store %arg6[%c0_10, %c0_11], %10 {strides = array<i32>} : memref<16x128xf32, #tpu.memory_space<vmem>>, vector<16x128xf32>,
    } else {
    }
    %c0 = arith.constant 0 : index
    %c0_1 = arith.constant 0 : index
    %3 = vector.load %arg6[%c0, %c0_1] : memref<16x128xf32, #tpu.memory_space<vmem>>, vector<16x128xf32>
    %c0_2 = arith.constant 0 : index
    %c0_3 = arith.constant 0 : index
    %4 = vector.load %arg4[%c0_2, %c0_3] : memref<16x128xbf16, #tpu.memory_space<vmem>>, vector<16x128xbf16>
    %c0_4 = arith.constant 0 : index
    %c0_5 = arith.constant 0 : index
    %c0_6 = arith.constant 0 : index
    %5 = vector.load %arg5[%c0_4, %c0_5, %c0_6] : memref<1x128x128xbf16, #tpu.memory_space<vmem>>, vector<1x128x128xbf16>
    %6 = vector.shape_cast %5 : vector<1x128x128xbf16> to vector<128x128xbf16>
    %cst = arith.constant dense<0.000000e+00> : vector<16x128xf32>
    %7 = tpu.matmul %4, %6, %cst {dimension_numbers = #tpu.dot_dimension_numbers<[1], [0], [0], [1], [0, 0, 1, 1], [], []>} : vector<16x128xbf16>, vector<128x128xbf16>, vector<16x128xf32> -> vector<16x128xf32>
    %8 = arith.addf %3, %7 : vector<16x128xf32>
    %c0_7 = arith.constant 0 : index
    %c0_8 = arith.constant 0 : index
    %9 = vector.load %arg6[%c0_7, %c0_8] : memref<16x128xf32, #tpu.memory_space<vmem>>, vector<16x128xf32>
    tpu.vector_store %arg6[%c0_7, %c0_8], %8 {strides = array<i32>} : memref<16x128xf32, #tpu.memory_space<vmem>>, vector<16x128xf32>,
    return
  }
  func.func @transform_0(%arg0: i32, %arg1: i32, %arg2: i32, %arg3: i32) -> (i32, i32) {
    %c0_i32 = arith.constant 0 : i32
    return %arg0, %arg3 : i32, i32
  }
  func.func @transform_1(%arg0: i32, %arg1: i32, %arg2: i32, %arg3: i32) -> (i32, i32, i32) {
    %c0_i32 = arith.constant 0 : i32
    return %arg1, %arg3, %arg2 : i32, i32, i32
  }
  func.func @transform_2(%arg0: i32, %arg1: i32, %arg2: i32, %arg3: i32) -> (i32, i32) {
    %c1_i32 = arith.constant 1 : i32
    %0 = arith.muli %arg1, %c1_i32 : i32
    %1 = arith.addi %0, %arg2 : i32
    %c0_i32 = arith.constant 0 : i32
    return %arg0, %1 : i32, i32
  }
}

</mosaic_0001>

<bundles_post_ra>
// kernel: model_parallel_linear.1
= control target key start
LH: loop header
LB: loop body
LE: loop exit
PB: predicated region body
PF: predicated region fallthrough
CT: control target
= control target key end

     0   :  { %s661_s9 = smov 0   ;;  %s663_s10 = smov 0   ;;  %s734_s0 = inlined_call_operand.vmem [shape: bf16[16,128], index: 0, kind: input, shape index: {}]   ;;  %s735_s1 = inlined_call_operand.vmem [shape: bf16[2,128,128], index: 1, kind: input, shape index: {}]   ;;  %s736_s2 = inlined_call_operand.vmem [shape: f32[16,256], index: 2, kind: output, shape index: {}]  }
   0x1   :  { %s665_s11 = smov 0   ;;  %s667_s12 = smov 0  }
   0x2   :  { %s669_s13 = smov 0  }
   0x3 LB: > { %s501_s14 = sadd.s32 4294967295, %s642_s13   ;;  %s34_s15 = sadd.s32 1, %s638_s12  ;;  %s642_s13 = sphi %s669_s13, %s12_s13   ;;  %s638_s12 = sphi %s667_s12, %s741_s12   ;;  %s634_s11 = sphi %s665_s11, %s740_s11   ;;  %s630_s10 = sphi %s663_s10, %s739_s10   ;;  %s626_s9 = sphi %s661_s9, %s738_s9  }
   0x4   : > { %p36_p0 = scmp.ge.s32.totalorder %s34_s15, 2  ;;  %s107_s16 = sadd.s32 1, %s630_s10 }
   0x5   : > { %p117_p1 = scmp.ne.s32.totalorder %s630_s10, %s626_s9  ;;  %p118_p2 = scmp.eq.s32.totalorder %s501_s14, 1 }
   0x6   : > { %s743_s15 = smov (%p36_p0, %s34_s15), 0  ;;  %p506_p4 = scmp.ge.s32.totalorder %s642_s13, 1 }
   0x7   : > { %p693_p3 = por %p118_p2, %p117_p1  ;;  %s103_s18 = ssub.s32 %s638_s12, %s743_s15 }
   0x8   : > { %p170_p5 = scmp.lt.s32.totalorder %s642_s13, 3  ;;  %p105_p6 = scmp.eq.s32.totalorder %s103_s18, 0 }
   0xa   : > { %p171_p7 = pnand %p506_p4, %p170_p5 }
   0xb   : > { %s702_s19 = scalar_select %p105_p6, %s630_s10, %s107_s16  }
   0xc   : > { %174 = sbr.rel (%p171_p7) target bundleno = 259 (0x103), region = 28  ;;  %p216_p8 = scmp.lt.s32.totalorder (!%p171_p7), %s634_s11, 1 }
   0xd   : > { %s203_s27 = sand.u32 (!%p171_p7), 1, %s626_s9  }
   0xe   : > { %s507_s28 = sshll.u32 (!%p171_p7), %s203_s27, 4 }
   0xf   : > { %s205_s29 = scalar_lea.vmem (!%p171_p7), [#allocation2], %s507_s28 }
  0x11   : > { %v644_v0 = vmov 0.0   ;;  %vm645_vm0 = vmmov 0   ;;  %s217_s20 = scalar_select %p216_p8, %s634_s11, 1  ;;  %v603_v9 = vld [vmem:[%s734_s0] sm:$0xff]  }
  0x12   : > { %533 = vmatprep.subr.bf16.mxu0 %v644_v0  ;;  %549 = vmatprep.mubr.msk.bf16.mxu0 %vm645_vm0, %v644_v0  ;;  %s520_s30 = sshll.u32 (%p693_p3), %s634_s11, 3 }
  0x13   : > { %s523_s21 = sshll.u32 %s217_s20, 6  ;;  %s368_s5 = scalar_lea.vmem (%p693_p3), %s736_s2, %s520_s30 }
  0x14   : > { %s226_s24 = scalar_lea.vmem %s735_s1, %s523_s21 }
  0x15   : > { %v595_v1 = vld [vmem:[%s226_s24 + $0x38] sm:$0xff]   ;;  %v596_v2 = vld [vmem:[%s226_s24 + $0x30] sm:$0xff]   ;;  %v597_v3 = vld [vmem:[%s226_s24 + $0x28] sm:$0xff]  }
  0x16   : > { %534 = vmatpush3.bf16.msra.mxu0 %v595_v1  ;;  %v598_v4 = vld [vmem:[%s226_s24 + $0x20] sm:$0xff]   ;;  %v599_v5 = vld [vmem:[%s226_s24 + $0x18] sm:$0xff]   ;;  %v600_v6 = vld [vmem:[%s226_s24 + $0x10] sm:$0xff]  }
  0x17   : > { %535 = vmatprep.subr.bf16.mxu0 %v644_v0  ;;  %v601_v7 = vld [vmem:[%s226_s24 + $0x8] sm:$0xff]   ;;  %v602_v8 = vld [vmem:[%s226_s24] sm:$0xff]  }
  0x1a   : > { %536 = vmatpush3.bf16.msra.mxu0 %v596_v2 }
  0x1b   : > { %537 = vmatprep.subr.bf16.mxu0 %v644_v0 }
  0x1e   : > { %538 = vmatpush3.bf16.msra.mxu0 %v597_v3 }
  0x1f   : > { %539 = vmatprep.subr.bf16.mxu0 %v644_v0 }
  0x22   : > { %540 = vmatpush3.bf16.msra.mxu0 %v598_v4 }
  0x23   : > { %541 = vmatprep.subr.bf16.mxu0 %v644_v0 }
  0x26   : > { %542 = vmatpush3.bf16.msra.mxu0 %v599_v5 }
  0x27   : > { %543 = vmatprep.subr.bf16.mxu0 %v644_v0 }
  0x2a   : > { %544 = vmatpush3.bf16.msra.mxu0 %v600_v6 }
  0x2b   : > { %545 = vmatprep.subr.bf16.mxu0 %v644_v0 }
  0x2e   : > { %546 = vmatpush3.bf16.msra.mxu0 %v601_v7 }
  0x2f   : > { %547 = vmatprep.subr.bf16.mxu0 %v644_v0 }
  0x32   : > { %548 = vmatpush3.bf16.msra.mxu0 %v602_v8 }
  0x35   : > { %550 = vmatmul.mubr.bf16.vlgmr.msra.gmra.mxu0 %v603_v9 }
  0xf5   : > { %v345_v10 = vpop.f32.mrf.mxu0 }
  0xf6   : > { %354 = vst [vmem:[%s205_s29] sm:$0xff] %v345_v10 }
  0xf7   : > { %v551_v11 = vpop.f32.mrf.mxu0  ;;  %362 = sbr.rel (!%p693_p3) target bundleno = 259 (0x103), region = 36 }
  0xf9   : > { %v348_v12 = vpop.f32.mrf.mxu0 }
  0xfa   : > { %355 = vst [vmem:[%s205_s29 + $0x8] sm:$0xff] %v348_v12 }
  0xfb   : > { %v552_v13 = vpop.f32.mrf.mxu0 }
  0xfd   : > { %v399_v14 = vld [vmem:[%s205_s29] sm:$0xff] }
  0xfe   : > { %400 = vst [vmem:[%s368_s5] sm:$0xff] %v399_v14 }
 0x101   : > { %v401_v15 = vld [vmem:[%s205_s29 + $0x8] sm:$0xff] }
 0x102   : > { %402 = vst [vmem:[%s368_s5 + $0x10] sm:$0xff] %v401_v15 }
 0x103 PF: > { %s12_s13 = sadd.s32 1, %s642_s13   ;;  %s738_s9 = smov %s630_s10 }
 0x104   : > { %p9_p9 = scmp.ge.s32.totalorder %s12_s13, 4   ;;  %s739_s10 = smov %s702_s19 }
 0x105   : > { %s740_s11 = smov %s638_s12  ;;  %s741_s12 = smov %s743_s15 }
 0x106   :  { %11 = sbr.rel (!%p9_p9) target bundleno = 3 (0x3), region = 103 }

</bundles_post_ra>
